<compile_context>
chip_gen: v6e
topology: v6e:2x2x1
jax: 0.10.0
libtpu: 0.0.40
codegen_flags: <defaults>
</compile_context>

<pallas_src>
import jax
import jax.numpy as jnp
from jax.experimental import pallas as pl
from jax.experimental.pallas import tpu as pltpu


def _round_up(n, m):
    return ((n + m - 1) // m) * m


def nested_boring_kernel(x_ref, w_ref, b_ref, o_ref):
    # Composed affine map: h = x @ Wc + bc   (Wc already [in, out])
    h = jnp.dot(x_ref[...], w_ref[...],
                preferred_element_type=jnp.float32) + b_ref[...]
    # Row softmax over the (unpadded) 20-wide feature dim; Mosaic masks dead lanes.
    m = jnp.max(h, axis=-1, keepdims=True)
    e = jnp.exp(h - m)
    denom = jnp.sum(e, axis=-1, keepdims=True)
    o_ref[...] = (e / denom).astype(o_ref.dtype)   # exact division (kernel is DMA-bound)


def _choose_tile(batch, tm):
    """Batch tile: multiple of 8, capped so there are >= 2 grid steps whenever the
    batch allows it (so the 'parallel' grid axis can use both v7x TensorCores),
    and capped by the requested tm (default 4096 ~= 8 MiB of double-buffered VMEM
    in 128-lane layout, safe on v5e/v6e/v7x)."""
    tm = max(8, _round_up(tm, 8))
    cap = _round_up(pl.cdiv(batch, 2), 8) if batch > 8 else 8
    return min(tm, cap)


def nested_boring_model(x, params, *, tm=4096):
    """x: [B, 20] float32; params: dict of (w1,b1,w2,b2,w3,b3) in torch layout."""
    w1, b1 = params["w1"], params["b1"]
    w2, b2 = params["w2"], params["b2"]
    w3, b3 = params["w3"], params["b3"]

    # Compose the three nn.Linear layers (y = x @ W^T + b) into one affine map,
    # pre-transposed to [in_features, out_features].
    wc = (w1.T @ w2.T @ w3.T).astype(jnp.float32)             # [20, 20]
    bc = ((b1 @ w2.T + b2) @ w3.T + b3).astype(jnp.float32)   # [20]

    B, F = x.shape
    tm_eff = _choose_tile(B, tm)
    grid = (pl.cdiv(B, tm_eff),)   # ragged last block: OOB rows masked on writeback

    return pl.pallas_call(
        nested_boring_kernel,
        out_shape=jax.ShapeDtypeStruct((B, F), x.dtype),
        grid_spec=pltpu.PrefetchScalarGridSpec(
            num_scalar_prefetch=0,
            grid=grid,
            in_specs=[
                pl.BlockSpec((tm_eff, F), lambda i: (i, 0)),   # x tile, unpadded lanes
                pl.BlockSpec((F, F), lambda i: (0, 0)),        # composed W, VMEM-resident
                pl.BlockSpec((1, F), lambda i: (0, 0)),        # composed bias, resident
            ],
            out_specs=pl.BlockSpec((tm_eff, F), lambda i: (i, 0)),
        ),
        compiler_params=pltpu.CompilerParams(
            dimension_semantics=("parallel",),
            vmem_limit_bytes=32 * 1024 * 1024,
        ),
    )(x.astype(jnp.float32), wc, bc.reshape(1, F))


def init_params(key, in_f=20, out_f=20):
    """Deterministic init mimicking torch.nn.Linear default (uniform +/- 1/sqrt(fan_in))."""
    bound = 1.0 / jnp.sqrt(jnp.float32(in_f))
    keys = jax.random.split(key, 6)

    def u(k, shape):
        return jax.random.uniform(k, shape, dtype=jnp.float32,
                                  minval=-bound, maxval=bound)

    return {
        "w1": u(keys[0], (out_f, in_f)), "b1": u(keys[1], (out_f,)),
        "w2": u(keys[2], (out_f, in_f)), "b2": u(keys[3], (out_f,)),
        "w3": u(keys[4], (out_f, in_f)), "b3": u(keys[5], (out_f,)),
    }


def _reference(x, params):
    """Layer-by-layer pure-JAX reference matching the PyTorch module."""
    h = x @ params["w1"].T + params["b1"]
    h = h @ params["w2"].T + params["b2"]
    h = h @ params["w3"].T + params["b3"]
    return jax.nn.softmax(h, axis=-1)


if __name__ == "__main__":
    key = jax.random.PRNGKey(0)
    k_x, k_x2, k_p = jax.random.split(key, 3)

    F = 20  # feature dim fixed at 20 by the module
    params = init_params(k_p, in_f=F, out_f=F)

    # Case 1: small aligned batch (single grid step).
    B = 8
    x = jax.random.normal(k_x, (B, F), dtype=jnp.float32)
    out = jax.block_until_ready(nested_boring_model(x, params))
    ref = _reference(x, params)
    assert out.shape == (B, F)
    row_sums = jnp.sum(out, axis=-1)
    assert bool(jnp.all(jnp.abs(row_sums - 1.0) < 1e-5)), row_sums
    assert bool(jnp.all(jnp.abs(out - ref) < 1e-3)), jnp.max(jnp.abs(out - ref))

    # Case 2: ragged batch (2 grid steps, last block partially out of bounds).
    B2 = 37
    x2 = jax.random.normal(k_x2, (B2, F), dtype=jnp.float32)
    out2 = jax.block_until_ready(nested_boring_model(x2, params))
    ref2 = _reference(x2, params)
    assert out2.shape == (B2, F)
    row_sums2 = jnp.sum(out2, axis=-1)
    assert bool(jnp.all(jnp.abs(row_sums2 - 1.0) < 1e-5)), row_sums2
    assert bool(jnp.all(jnp.abs(out2 - ref2) < 1e-3)), jnp.max(jnp.abs(out2 - ref2))

    print("KERNEL_OK")
</pallas_src>

<mosaic_0001>
module attributes {stable_mosaic.version = 11 : i64} {
  func.func @nested_boring_kernel(%arg0: i32, %arg1: memref<8x20xf32, #tpu.memory_space<vmem>>, %arg2: memref<20x20xf32, #tpu.memory_space<vmem>>, %arg3: memref<1x20xf32, #tpu.memory_space<vmem>>, %arg4: memref<8x20xf32, #tpu.memory_space<vmem>>) attributes {dimension_semantics = [#tpu.dimension_semantics<parallel>], iteration_bounds = array<i64: 1>, scalar_prefetch = 0 : i64, scratch_operands = 0 : i64, tpu.core_type = #tpu.core_type<tc>, window_params = [{transform_indices = @transform_0, window_bounds = array<i64: 8, 20>}, {pipeline_mode = #tpu.pipeline_mode<synchronous>, transform_indices = @transform_1, window_bounds = array<i64: 20, 20>}, {pipeline_mode = #tpu.pipeline_mode<synchronous>, transform_indices = @transform_2, window_bounds = array<i64: 1, 20>}, {transform_indices = @transform_3, window_bounds = array<i64: 8, 20>}]} {
    %c0 = arith.constant 0 : index
    %c0_0 = arith.constant 0 : index
    %0 = vector.load %arg1[%c0, %c0_0] : memref<8x20xf32, #tpu.memory_space<vmem>>, vector<8x20xf32>
    %c0_1 = arith.constant 0 : index
    %c0_2 = arith.constant 0 : index
    %1 = vector.load %arg2[%c0_1, %c0_2] : memref<20x20xf32, #tpu.memory_space<vmem>>, vector<20x20xf32>
    %cst = arith.constant dense<0.000000e+00> : vector<8x20xf32>
    %2 = tpu.matmul %0, %1, %cst {dimension_numbers = #tpu.dot_dimension_numbers<[1], [0], [0], [1], [0, 0, 1, 1], [], []>} : vector<8x20xf32>, vector<20x20xf32>, vector<8x20xf32> -> vector<8x20xf32>
    %c0_3 = arith.constant 0 : index
    %c0_4 = arith.constant 0 : index
    %3 = vector.load %arg3[%c0_3, %c0_4] : memref<1x20xf32, #tpu.memory_space<vmem>>, vector<1x20xf32>
    %4 = vector.broadcast %3 : vector<1x20xf32> to vector<8x20xf32>
    %5 = arith.addf %2, %4 : vector<8x20xf32>
    %cst_5 = arith.constant dense<0xFF800000> : vector<8xf32>
    %6 = vector.multi_reduction <maximumf>, %5, %cst_5 [1] : vector<8x20xf32> to vector<8xf32>
    %7 = vector.shape_cast %6 : vector<8xf32> to vector<8x1xf32>
    %8 = vector.broadcast %7 : vector<8x1xf32> to vector<8x20xf32>
    %9 = arith.subf %5, %8 : vector<8x20xf32>
    %10 = math.exp %9 : vector<8x20xf32>
    %cst_6 = arith.constant dense<0.000000e+00> : vector<8xf32>
    %11 = vector.multi_reduction <add>, %10, %cst_6 [1] : vector<8x20xf32> to vector<8xf32>
    %12 = vector.shape_cast %11 : vector<8xf32> to vector<8x1xf32>
    %13 = vector.broadcast %12 : vector<8x1xf32> to vector<8x20xf32>
    %14 = arith.divf %10, %13 : vector<8x20xf32>
    %c0_7 = arith.constant 0 : index
    %c0_8 = arith.constant 0 : index
    %15 = vector.load %arg4[%c0_7, %c0_8] : memref<8x20xf32, #tpu.memory_space<vmem>>, vector<8x20xf32>
    tpu.vector_store %arg4[%c0_7, %c0_8], %14 {strides = array<i32>} : memref<8x20xf32, #tpu.memory_space<vmem>>, vector<8x20xf32>,
    return
  }
  func.func @transform_0(%arg0: i32) -> (i32, i32) {
    %c0_i32 = arith.constant 0 : i32
    %c0_i32_0 = arith.constant 0 : i32
    return %arg0, %c0_i32 : i32, i32
  }
  func.func @transform_1(%arg0: i32) -> (i32, i32) {
    %c0_i32 = arith.constant 0 : i32
    %c0_i32_0 = arith.constant 0 : i32
    %c0_i32_1 = arith.constant 0 : i32
    return %c0_i32, %c0_i32_0 : i32, i32
  }
  func.func @transform_2(%arg0: i32) -> (i32, i32) {
    %c0_i32 = arith.constant 0 : i32
    %c0_i32_0 = arith.constant 0 : i32
    %c0_i32_1 = arith.constant 0 : i32
    return %c0_i32, %c0_i32_0 : i32, i32
  }
  func.func @transform_3(%arg0: i32) -> (i32, i32) {
    %c0_i32 = arith.constant 0 : i32
    %c0_i32_0 = arith.constant 0 : i32
    return %arg0, %c0_i32 : i32, i32
  }
}

</mosaic_0001>

<bundles_post_ra>
// kernel: tpu_custom_call.1
= control target key start
LH: loop header
LB: loop body
LE: loop exit
PB: predicated region body
PF: predicated region fallthrough
CT: control target
= control target key end

     0   :  { %8 = vsyncpa [#allocation3], 0  ;;  %s294_s0 = inlined_call_operand.hbm [shape: f32[8,20], index: 0, kind: input, shape index: {}]   ;;  %s295_s1 = inlined_call_operand.hbm [shape: f32[20,20], index: 1, kind: input, shape index: {}]   ;;  %s296_s2 = inlined_call_operand.vmem [shape: f32[1,20], index: 2, kind: input, shape index: {}]   ;;  %s297_s3 = inlined_call_operand.hbm [shape: f32[8,20], index: 3, kind: output, shape index: {}]  }
   0x1   :  { %9 = vsyncpa [#allocation6], 0 }
   0x2   :  { %10 = vsyncpa [#allocation4], 0  ;;  %s251_s12 = smov [#allocation2]   ;;  %s252_s14 = smov [#allocation5]  }
   0x3   :  { %s17_s13 = sshll.u32 %s251_s12, 4  ;;  %s26_s15 = sshll.u32 %s252_s14, 4  ;;  %s18_s13 = int_to_ptr.vmem [resolvable:$true] %s17_s13  ;;  %s27_s15 = int_to_ptr.vmem [resolvable:$true] %s26_s15 }
   0x4   :  { %s193_s16 = scalar_lea.vmem %s18_s13, 128  ;;  %p198_p1 = scmp.lt.s32.totalorder %s18_s13, %s18_s13 }
   0x5   :  { %p194_p0 = scmp.ne.s32.totalorder %s18_s13, %s193_s16  ;;  %p199_p2 = scmp.lt.s32.totalorder %s193_s16, %s193_s16 }
   0x7   :  { %p200_p3 = por %p199_p2, %p198_p1 }
   0x9   :  { %p201_p4 = pnand %p200_p3, %p194_p0 }
   0xb   :  { %204 = shalt.err (!%p201_p4)
}
   0xc   :  { %20 = dma.hbm_to_vmem [thread:$0]  %s294_s0, 128, %s18_s13, [#allocation3]  }
   0xd   :  { %s213_s19 = scalar_lea.vmem %s27_s15, 384  ;;  %p218_p6 = scmp.lt.s32.totalorder %s27_s15, %s27_s15 }
   0xe   :  { %p214_p5 = scmp.ne.s32.totalorder %s27_s15, %s213_s19  ;;  %p219_p7 = scmp.lt.s32.totalorder %s213_s19, %s213_s19 }
  0x10   :  { %p220_p8 = por %p219_p7, %p218_p6 }
  0x12   :  { %p221_p9 = pnand %p220_p8, %p214_p5 }
  0x14   :  { %224 = shalt.err (!%p221_p9)
}
  0x15   :  { %s253_s20 = smov 128   ;;  %s254_s21 = smov 8  }
  0x16   :  { %32 = dma.hbm_to_vmem [thread:$0]  %s295_s1, 384, %s27_s15, [#allocation6], %s253_s20, %s253_s20, %s254_s21  }
  0x17   :  { %245 = dma.done.wait [#allocation3], 128  }
  0x18   :  { %246 = vsyncadd [#allocation3], 4294967168 }
  0x19   :  { %247 = dma.done.wait [#allocation6], 384  }
  0x1a   :  { %248 = vsyncadd [#allocation6], 4294966912  ;;  %v255_v0 = vmov 0.0   ;;  %vm256_vm0 = vmmov 0   ;;  %vm56_vm1 = vcmask 1043456   ;;  %v43_v2 = vld [vmem:[#allocation5 + $0x8] sm:$0xff] }
  0x1b   :  { %165 = vmatprep.subr.mxu0 %v255_v0  ;;  %171 = vmatprep.mubr.msk.f32.mxu0 %vm256_vm0, %v255_v0  ;;  %v44_v1 = vld [vmem:[#allocation5 + $0x10] sm:$0xf]  ;;  %v42_v3 = vld [vmem:[#allocation5] sm:$0xff]  ;;  %v41_v4 = vld [vmem:[#allocation2] sm:$0xff]  ;;  %vm52_vm2 = vcmask 162816   ;;  %s257_s24 = smov [#allocation7]  }
  0x1c   :  { %166 = vmatpush3.msk.msra.mxu0 %vm56_vm1, %v44_v1  ;;  %v158_v5 = vld [vmem:[%s296_s2] ss:$0 sm:$0xff]  ;;  %s148_s25 = sshll.u32 %s257_s24, 4  ;;  %s149_s25 = int_to_ptr.vmem [resolvable:$true] %s148_s25 }
  0x1d   :  { %167 = vmatprep.subr.mxu0 %v255_v0  ;;  %s225_s2 = scalar_lea.vmem %s149_s25, 128  ;;  %p230_p11 = scmp.lt.s32.totalorder %s149_s25, %s149_s25 }
  0x1e   :  { %168 = vmatpush3.msra.mxu0 %v43_v2  ;;  %p226_p10 = scmp.ne.s32.totalorder %s149_s25, %s225_s2  ;;  %p231_p12 = scmp.lt.s32.totalorder %s225_s2, %s225_s2 }
  0x1f   :  { %169 = vmatprep.subr.mxu0 %v255_v0 }
  0x20   :  { %170 = vmatpush3.msra.mxu0 %v42_v3  ;;  %p232_p13 = por %p231_p12, %p230_p11 }
  0x21   :  { %172 = vmatmul.mubr.msk.f32.vlgmr.msra.gmra.mxu0 %vm52_vm2, %v41_v4 }
  0x22   :  { %p233_p0 = pnand %p232_p13, %p226_p10 }
  0xe1   :  { %v126_v6 = vpop.f32.mrf.mxu0 }
  0xe2   :  { %v127_v7 = vadd.f32 %v158_v5, %v126_v6 }
  0xe3   :  { %v173_v8 = vpop.f32.mrf.mxu0 }
  0xe4   :  { %v130_v9 = vsel %vm52_vm2, %v127_v7, -inf }
  0xe5   :  { %131 = vmax.xlane.f32.xlu0 %v130_v9 }
 0x16e   :  { %v132_v10 = vpop.xlane.xlu0 %131 }
 0x16f   :  { %v133_v11 = vsub.f32 %v127_v7, %v132_v10 }
 0x171   :  { %v134_v12 = vmul.f32 1.442695, %v133_v11 }
 0x173   :  { %181 = vpow2.f32 %v134_v12 }
 0x180   :  { %v182_v13 = vpop.eup %181 }
 0x181   :  { %v136_v14 = vsel %vm52_vm2, %v182_v13, 0.0 }
 0x182   :  { %137 = vadd.xlane.f32.xlu0 %v136_v14 }
 0x20b   :  { %v138_v15 = vpop.xlane.xlu0 %137 }
 0x20c   :  { %183 = vrcp.f32 %v138_v15 }
 0x219   :  { %v184_v16 = vpop.eup %183 }
 0x21a   :  { %v140_v17 = vmul.f32 %v184_v16, %v182_v13 }
 0x21c   :  { %141 = vst.msk [vmem:[#allocation7] sm:$0xff] %vm52_vm2, %v140_v17 }
 0x21d   :  { %236 = shalt.err (!%p233_p0)
}
 0x21e   :  { %151 = dma.vmem_to_hbm [thread:$0]  %s149_s25, 128, %s297_s3, [#allocation4]  }
 0x21f   :  { %249 = dma.done.wait [#allocation4], 128  }
 0x220   :  { %250 = vsyncadd [#allocation4], 4294967168 }
 0x221   :  { %155 = vsyncpa [#allocation3], 1 }
 0x222   :  { %156 = vsyncpa [#allocation6], 1 }
 0x223   :  { %157 = vsyncpa [#allocation4], 1 }

</bundles_post_ra>
